<compile_context>
chip_gen: v6e
topology: v6e:2x2x1
jax: 0.10.0
libtpu: 0.0.40
codegen_flags: <defaults>
</compile_context>

<pallas_src>
import math
import jax
import jax.numpy as jnp
from jax.experimental import pallas as pl
from jax.experimental.pallas import tpu as pltpu

LN_EPS = 1e-5  # matches torch.nn.LayerNorm default


def _round_up(n, m):
    return ((n + m - 1) // m) * m


def mlp_layer_kernel(x_ref, w_ref, b_ref, o_ref):
    """Fused LayerNorm + (gamma/beta-folded) matmul + SiLU for one MLPLayer.

    x_ref: (bm, Din)   tile of input rows (f32 or bf16)
    w_ref: (Din, tn)   gamma-folded linear weight, bf16, already transposed
    b_ref: (1, tn)     beta-folded bias row, f32
    o_ref: (bm, tn)    output tile
    """
    x = x_ref[...].astype(jnp.float32)

    # LayerNorm statistics over the last axis (biased variance, like torch).
    mean = jnp.mean(x, axis=-1, keepdims=True)
    centered = x - mean
    var = jnp.mean(centered * centered, axis=-1, keepdims=True)
    xn = centered * jax.lax.rsqrt(var + LN_EPS)

    # gamma/beta are folded into w/b by the wrapper, so go straight to the MXU.
    # bf16 x bf16 inputs with f32 accumulation.
    y = jnp.dot(xn.astype(w_ref.dtype), w_ref[...],
                preferred_element_type=jnp.float32)
    y = y + b_ref[...].astype(jnp.float32)

    # SiLU activation.
    o_ref[...] = (y * jax.nn.sigmoid(y)).astype(o_ref.dtype)


def mlp_layer(x, gamma, beta, w_t, *, bm=256, tn=512, out_dtype=None):
    """Apply one fused MLP layer.

    x:   (B, Din)
    w_t: (Din, Dout)  weight stored transposed (torch keeps (out, in))
    Tile sizes: bm rows x tn output columns per grid step. With bm=256, tn=512
    and bf16 weights the double-buffered VMEM footprint stays well inside the
    default scoped limit even for Din up to a few thousand; shrink bm/tn for
    very large Din on v7x (64 MiB physical VMEM).
    """
    B, Din = x.shape
    Dout = w_t.shape[1]
    out_dtype = out_dtype if out_dtype is not None else x.dtype

    # Fold LayerNorm affine into the linear layer (f32 math, then bf16 weight):
    #   (xn*gamma + beta) @ W == xn @ (gamma[:,None]*W) + (beta @ W)
    w32 = w_t.astype(jnp.float32)
    w_folded = gamma.astype(jnp.float32)[:, None] * w32
    bias = (beta.astype(jnp.float32) @ w32).reshape(1, Dout)

    # Pad Dout to a lane-dense multiple of 128 (avoids masked partial stores).
    Dout_p = _round_up(Dout, 128)
    if Dout_p != Dout:
        w_folded = jnp.pad(w_folded, ((0, 0), (0, Dout_p - Dout)))
        bias = jnp.pad(bias, ((0, 0), (0, Dout_p - Dout)))
    w_folded = w_folded.astype(jnp.bfloat16)

    bm = min(bm, _round_up(B, 16))      # 16-row granule (bf16 sublane packing)
    tn = min(tn, Dout_p)                # multiple of 128 by construction

    grid = (pl.cdiv(B, bm), pl.cdiv(Dout_p, tn))

    out = pl.pallas_call(
        mlp_layer_kernel,
        out_shape=jax.ShapeDtypeStruct((B, Dout_p), out_dtype),
        grid_spec=pltpu.PrefetchScalarGridSpec(
            num_scalar_prefetch=0,
            grid=grid,
            in_specs=[
                pl.BlockSpec((bm, Din), lambda i, j: (i, 0)),   # rows (Din whole)
                pl.BlockSpec((Din, tn), lambda i, j: (0, j)),   # weight col tile
                pl.BlockSpec((1, tn), lambda i, j: (0, j)),     # bias col tile
            ],
            out_specs=pl.BlockSpec((bm, tn), lambda i, j: (i, j)),
        ),
        compiler_params=pltpu.CompilerParams(
            dimension_semantics=("parallel", "parallel")),
    )(x, w_folded, bias)

    return out[:, :Dout] if Dout_p != Dout else out


def init_mlp_params(key, layers_hidden):
    """Deterministic params mimicking the PyTorch module's __init__ shapes."""
    params = []
    for input_dim, output_dim in zip(layers_hidden, layers_hidden[1:]):
        key, wk = jax.random.split(key)
        # kaiming_uniform_(a=sqrt(5)): bound = sqrt(1 / fan_in)
        bound = math.sqrt(1.0 / input_dim)
        # torch stores weight as (out, in); we keep it transposed as (in, out).
        w_t = jax.random.uniform(
            wk, (input_dim, output_dim), jnp.float32, -bound, bound)
        gamma = jnp.ones((input_dim,), jnp.float32)   # LayerNorm weight
        beta = jnp.zeros((input_dim,), jnp.float32)   # LayerNorm bias
        params.append((gamma, beta, w_t))
    return params


def mlp_forward(x, params, *, activation_dtype=jnp.bfloat16):
    """Run the stacked MLP. Hidden activations are kept in bf16 to halve the
    inter-layer HBM round-trip; the final layer returns the input dtype."""
    # TODO(synk): fuse consecutive layers into one kernel when both weight
    # tiles fit VMEM, to avoid the remaining inter-layer HBM round-trip.
    n = len(params)
    h = x
    for idx, (gamma, beta, w_t) in enumerate(params):
        layer_out_dtype = x.dtype if idx == n - 1 else activation_dtype
        h = mlp_layer(h, gamma, beta, w_t, out_dtype=layer_out_dtype)
    return h


def mlp_forward_ref(x, params):
    """Pure-JAX f32 reference (torch semantics) for correctness checking."""
    for gamma, beta, w_t in params:
        mean = jnp.mean(x, axis=-1, keepdims=True)
        var = jnp.mean((x - mean) ** 2, axis=-1, keepdims=True)
        xn = (x - mean) / jnp.sqrt(var + LN_EPS)
        xn = xn * gamma + beta
        y = xn @ w_t
        x = y * jax.nn.sigmoid(y)
    return x


if __name__ == "__main__":
    key = jax.random.PRNGKey(0)
    layers_hidden = [32, 64, 32]   # MLP([32, 64, 32]) -> two MLPLayers
    batch = 64

    pkey, xkey = jax.random.split(key)
    params = init_mlp_params(pkey, layers_hidden)
    x = jax.random.normal(xkey, (batch, layers_hidden[0]), jnp.float32)

    out = jax.block_until_ready(mlp_forward(x, params))
    ref = jax.block_until_ready(mlp_forward_ref(x, params))

    assert out.shape == (batch, layers_hidden[-1])
    # Tolerance reflects bf16 weights/activations on the MXU (f32 accumulate).
    out32 = out.astype(jnp.float32)
    max_err = float(jnp.max(jnp.abs(out32 - ref)))
    assert jnp.allclose(out32, ref, atol=5e-2, rtol=5e-2), f"mismatch {max_err}"
    print("KERNEL_OK")
</pallas_src>

<mosaic_0001>
module attributes {stable_mosaic.version = 11 : i64} {
  func.func @mlp_layer_kernel(%arg0: i32, %arg1: i32, %arg2: memref<64x32xf32, #tpu.memory_space<vmem>>, %arg3: memref<32x128xbf16, #tpu.memory_space<vmem>>, %arg4: memref<1x128xf32, #tpu.memory_space<vmem>>, %arg5: memref<64x128xbf16, #tpu.memory_space<vmem>>) attributes {dimension_semantics = [#tpu.dimension_semantics<parallel>, #tpu.dimension_semantics<parallel>], iteration_bounds = array<i64: 1, 1>, scalar_prefetch = 0 : i64, scratch_operands = 0 : i64, tpu.core_type = #tpu.core_type<tc>, window_params = [{transform_indices = @transform_0, window_bounds = array<i64: 64, 32>}, {transform_indices = @transform_1, window_bounds = array<i64: 32, 128>}, {transform_indices = @transform_2, window_bounds = array<i64: 1, 128>}, {transform_indices = @transform_3, window_bounds = array<i64: 64, 128>}]} {
    %c0 = arith.constant 0 : index
    %c0_0 = arith.constant 0 : index
    %0 = vector.load %arg2[%c0, %c0_0] : memref<64x32xf32, #tpu.memory_space<vmem>>, vector<64x32xf32>
    %cst = arith.constant dense<0.000000e+00> : vector<64xf32>
    %1 = vector.multi_reduction <add>, %0, %cst [1] : vector<64x32xf32> to vector<64xf32>
    %2 = vector.shape_cast %1 : vector<64xf32> to vector<64x1xf32>
    %cst_1 = arith.constant 3.200000e+01 : f32
    %3 = vector.broadcast %cst_1 : f32 to vector<64x1xf32>
    %4 = arith.divf %2, %3 : vector<64x1xf32>
    %5 = vector.broadcast %4 : vector<64x1xf32> to vector<64x32xf32>
    %6 = arith.subf %0, %5 : vector<64x32xf32>
    %7 = arith.mulf %6, %6 : vector<64x32xf32>
    %cst_2 = arith.constant dense<0.000000e+00> : vector<64xf32>
    %8 = vector.multi_reduction <add>, %7, %cst_2 [1] : vector<64x32xf32> to vector<64xf32>
    %9 = vector.shape_cast %8 : vector<64xf32> to vector<64x1xf32>
    %cst_3 = arith.constant 3.200000e+01 : f32
    %10 = vector.broadcast %cst_3 : f32 to vector<64x1xf32>
    %11 = arith.divf %9, %10 : vector<64x1xf32>
    %cst_4 = arith.constant 9.99999974E-6 : f32
    %12 = vector.broadcast %cst_4 : f32 to vector<64x1xf32>
    %13 = arith.addf %11, %12 : vector<64x1xf32>
    %14 = math.rsqrt %13 : vector<64x1xf32>
    %15 = vector.broadcast %14 : vector<64x1xf32> to vector<64x32xf32>
    %16 = arith.mulf %6, %15 : vector<64x32xf32>
    %17 = arith.truncf %16 : vector<64x32xf32> to vector<64x32xbf16>
    %c0_5 = arith.constant 0 : index
    %c0_6 = arith.constant 0 : index
    %18 = vector.load %arg3[%c0_5, %c0_6] : memref<32x128xbf16, #tpu.memory_space<vmem>>, vector<32x128xbf16>
    %cst_7 = arith.constant dense<0.000000e+00> : vector<64x128xf32>
    %19 = tpu.matmul %17, %18, %cst_7 {dimension_numbers = #tpu.dot_dimension_numbers<[1], [0], [0], [1], [0, 0, 1, 1], [], []>} : vector<64x32xbf16>, vector<32x128xbf16>, vector<64x128xf32> -> vector<64x128xf32>
    %c0_8 = arith.constant 0 : index
    %c0_9 = arith.constant 0 : index
    %20 = vector.load %arg4[%c0_8, %c0_9] : memref<1x128xf32, #tpu.memory_space<vmem>>, vector<1x128xf32>
    %21 = vector.broadcast %20 : vector<1x128xf32> to vector<64x128xf32>
    %22 = arith.addf %19, %21 : vector<64x128xf32>
    %23 = arith.negf %22 : vector<64x128xf32>
    %24 = math.exp %23 : vector<64x128xf32>
    %cst_10 = arith.constant 1.000000e+00 : f32
    %25 = vector.broadcast %cst_10 : f32 to vector<64x128xf32>
    %26 = arith.addf %25, %24 : vector<64x128xf32>
    %27 = arith.divf %25, %26 : vector<64x128xf32>
    %28 = arith.mulf %22, %27 : vector<64x128xf32>
    %29 = arith.truncf %28 : vector<64x128xf32> to vector<64x128xbf16>
    %c0_11 = arith.constant 0 : index
    %c0_12 = arith.constant 0 : index
    %30 = vector.load %arg5[%c0_11, %c0_12] : memref<64x128xbf16, #tpu.memory_space<vmem>>, vector<64x128xbf16>
    tpu.vector_store %arg5[%c0_11, %c0_12], %29 {strides = array<i32>} : memref<64x128xbf16, #tpu.memory_space<vmem>>, vector<64x128xbf16>,
    return
  }
  func.func @transform_0(%arg0: i32, %arg1: i32) -> (i32, i32) {
    %c0_i32 = arith.constant 0 : i32
    %c0_i32_0 = arith.constant 0 : i32
    return %arg0, %c0_i32 : i32, i32
  }
  func.func @transform_1(%arg0: i32, %arg1: i32) -> (i32, i32) {
    %c0_i32 = arith.constant 0 : i32
    %c0_i32_0 = arith.constant 0 : i32
    return %c0_i32, %arg1 : i32, i32
  }
  func.func @transform_2(%arg0: i32, %arg1: i32) -> (i32, i32) {
    %c0_i32 = arith.constant 0 : i32
    %c0_i32_0 = arith.constant 0 : i32
    return %c0_i32, %arg1 : i32, i32
  }
  func.func @transform_3(%arg0: i32, %arg1: i32) -> (i32, i32) {
    %c0_i32 = arith.constant 0 : i32
    return %arg0, %arg1 : i32, i32
  }
}

</mosaic_0001>

<bundles_post_ra>
// kernel: tpu_custom_call.1
= control target key start
LH: loop header
LB: loop body
LE: loop exit
PB: predicated region body
PF: predicated region fallthrough
CT: control target
= control target key end

     0   :  { %vm24_vm0 = vcmask 261120   ;;  %s616_s0 = inlined_call_operand.vmem [shape: f32[64,32], index: 0, kind: input, shape index: {}]   ;;  %s617_s1 = inlined_call_operand.vmem [shape: bf16[32,128], index: 1, kind: input, shape index: {}]   ;;  %s618_s2 = inlined_call_operand.vmem [shape: f32[1,128], index: 2, kind: input, shape index: {}]   ;;  %s619_s3 = inlined_call_operand.hbm [shape: bf16[64,128], index: 3, kind: output, shape index: {}]  }
   0x1   :  { %v16_v0 = vld [vmem:[%s616_s0] sm:$0xff]  ;;  %v17_v2 = vld [vmem:[%s616_s0 + $0x8] sm:$0xff]  ;;  %v18_v7 = vld [vmem:[%s616_s0 + $0x10] sm:$0xff] }
   0x2   :  { %v20_v1 = vld [vmem:[%s616_s0 + $0x20] sm:$0xff]  ;;  %v25_v3 = vsel %vm24_vm0, %v16_v0, 0.0  ;;  %v21_v5 = vld [vmem:[%s616_s0 + $0x28] sm:$0xff]  ;;  %v28_v6 = vsel %vm24_vm0, %v17_v2, 0.0  ;;  %v19_v9 = vld [vmem:[%s616_s0 + $0x18] sm:$0xff] }
   0x3   :  { %v37_v4 = vsel %vm24_vm0, %v20_v1, 0.0  ;;  %26 = vadd.xlane.f32.xlu0 %v25_v3  ;;  %v40_v8 = vsel %vm24_vm0, %v21_v5, 0.0 }
   0x4   :  { %38 = vadd.xlane.f32.xlu1 %v37_v4 }
   0x5   :  { %8 = vsyncpa [#allocation3], 0  ;;  %v31_v10 = vsel %vm24_vm0, %v18_v7, 0.0  ;;  %v34_v11 = vsel %vm24_vm0, %v19_v9, 0.0  ;;  %v22_v12 = vld [vmem:[%s616_s0 + $0x30] sm:$0xff]  ;;  %v23_v13 = vld [vmem:[%s616_s0 + $0x38] sm:$0xff] }
   0x6   :  { %v43_v14 = vsel %vm24_vm0, %v22_v12, 0.0  ;;  %v46_v15 = vsel %vm24_vm0, %v23_v13, 0.0  ;;  %v425_v56 = vld [vmem:[%s617_s1 + $0x8] sm:$0xff]   ;;  %v426_v57 = vld [vmem:[%s617_s1] sm:$0xff]  }
   0x7   :  { %29 = vadd.xlane.f32.xlu0 %v28_v6  ;;  %406 = vmatprep.subr.bf16.mxu0 %v425_v56 }
   0x8   :  { %41 = vadd.xlane.f32.xlu1 %v40_v8  ;;  %418 = vmatprep.subr.bf16.mxu1 %v425_v56 }
   0x9   :  { %407 = vmatpush3.bf16.msra.mxu0 %v425_v56  ;;  %420 = vmatpush3.bf16.msra.mxu1 %v425_v56 }
   0xa   :  { %408 = vmatprep.subr.bf16.mxu0 %v426_v57  ;;  %419 = vmatprep.subr.bf16.mxu1 %v426_v57 }
   0xb   :  { %32 = vadd.xlane.f32.xlu0 %v31_v10 }
   0xc   :  { %35 = vadd.xlane.f32.xlu1 %v34_v11 }
   0xd   :  { %409 = vmatpush3.bf16.msra.mxu0 %v426_v57  ;;  %421 = vmatpush3.bf16.msra.mxu1 %v426_v57 }
   0xf   :  { %44 = vadd.xlane.f32.xlu0 %v43_v14 }
  0x10   :  { %47 = vadd.xlane.f32.xlu1 %v46_v15 }
  0x8c   :  { %v27_v16 = vpop.xlane.xlu0 %26 }
  0x8d   :  { %v39_v17 = vpop.xlane.xlu1 %38  ;;  %v50_v18 = vmul.f32 0.03125, %v27_v16 }
  0x8e   :  { %v54_v19 = vmul.f32 0.03125, %v39_v17 }
  0x8f   :  { %v552_v20 = vsub.f32 %v16_v0, %v50_v18 }
  0x90   :  { %v554_v21 = vsub.f32 %v20_v1, %v54_v19  ;;  %v30_v22 = vpop.xlane.xlu0 %29 }
  0x91   :  { %v42_v23 = vpop.xlane.xlu1 %41  ;;  %v51_v24 = vmul.f32 0.03125, %v30_v22  ;;  %v66_v26 = vmul.f32 %v552_v20, %v552_v20 }
  0x92   :  { %v55_v25 = vmul.f32 0.03125, %v42_v23  ;;  %v70_v27 = vmul.f32 %v554_v21, %v554_v21 }
  0x93   :  { %v560_v28 = vsub.f32 %v17_v2, %v51_v24  ;;  %v74_v30 = vsel %vm24_vm0, %v66_v26, 0.0 }
  0x94   :  { %v562_v29 = vsub.f32 %v21_v5, %v55_v25  ;;  %75 = vadd.xlane.f32.xlu0 %v74_v30  ;;  %v33_v31 = vpop.xlane.xlu0 %32  ;;  %v86_v33 = vsel %vm24_vm0, %v70_v27, 0.0 }
  0x95   :  { %v36_v32 = vpop.xlane.xlu1 %35  ;;  %v52_v34 = vmul.f32 0.03125, %v33_v31  ;;  %v67_v36 = vmul.f32 %v560_v28, %v560_v28 }
  0x96   :  { %v53_v35 = vmul.f32 0.03125, %v36_v32  ;;  %v71_v37 = vmul.f32 %v562_v29, %v562_v29 }
  0x97   :  { %v570_v38 = vsub.f32 %v18_v7, %v52_v34  ;;  %v77_v40 = vsel %vm24_vm0, %v67_v36, 0.0 }
  0x98   :  { %v572_v39 = vsub.f32 %v19_v9, %v53_v35  ;;  %87 = vadd.xlane.f32.xlu0 %v86_v33  ;;  %78 = vadd.xlane.f32.xlu1 %v77_v40  ;;  %v45_v41 = vpop.xlane.xlu0 %44  ;;  %v89_v43 = vsel %vm24_vm0, %v71_v37, 0.0 }
  0x99   :  { %v48_v42 = vpop.xlane.xlu1 %47  ;;  %v56_v44 = vmul.f32 0.03125, %v45_v41  ;;  %v68_v46 = vmul.f32 %v570_v38, %v570_v38 }
  0x9a   :  { %v57_v45 = vmul.f32 0.03125, %v48_v42  ;;  %v69_v47 = vmul.f32 %v572_v39, %v572_v39 }
  0x9b   :  { %v580_v48 = vsub.f32 %v22_v12, %v56_v44  ;;  %v80_v50 = vsel %vm24_vm0, %v68_v46, 0.0 }
  0x9c   :  { %v582_v49 = vsub.f32 %v23_v13, %v57_v45  ;;  %90 = vadd.xlane.f32.xlu1 %v89_v43  ;;  %81 = vadd.xlane.f32.xlu0 %v80_v50  ;;  %v83_v51 = vsel %vm24_vm0, %v69_v47, 0.0 }
  0x9d   :  { %v72_v52 = vmul.f32 %v580_v48, %v580_v48 }
  0x9e   :  { %v73_v53 = vmul.f32 %v582_v49, %v582_v49 }
  0x9f   :  { %v92_v54 = vsel %vm24_vm0, %v72_v52, 0.0 }
  0xa0   :  { %84 = vadd.xlane.f32.xlu1 %v83_v51  ;;  %93 = vadd.xlane.f32.xlu0 %v92_v54  ;;  %v95_v55 = vsel %vm24_vm0, %v73_v53, 0.0 }
  0xa4   :  { %96 = vadd.xlane.f32.xlu1 %v95_v55 }
 0x11d   :  { %v76_v58 = vpop.xlane.xlu0 %75 }
 0x11e   :  { %v98_v59 = vmul.f32 0.03125, %v76_v58 }
 0x120   :  { %v106_v60 = vadd.f32 1e-05, %v98_v59 }
 0x121   :  { %v79_v61 = vpop.xlane.xlu1 %78  ;;  %v88_v62 = vpop.xlane.xlu0 %87 }
 0x122   :  { %v99_v63 = vmul.f32 0.03125, %v79_v61  ;;  %v102_v0 = vmul.f32 0.03125, %v88_v62  ;;  %427 = vrsqrt.f32 %v106_v60 }
 0x124   :  { %v107_v1 = vadd.f32 1e-05, %v99_v63  ;;  %v110_v2 = vadd.f32 1e-05, %v102_v0 }
 0x125   :  { %v91_v3 = vpop.xlane.xlu1 %90  ;;  %v82_v4 = vpop.xlane.xlu0 %81 }
 0x126   :  { %429 = vrsqrt.f32 %v107_v1  ;;  %v103_v5 = vmul.f32 0.03125, %v91_v3  ;;  %v100_v6 = vmul.f32 0.03125, %v82_v4 }
 0x127   :  { %431 = vrsqrt.f32 %v110_v2 }
 0x128   :  { %v111_v7 = vadd.f32 1e-05, %v103_v5  ;;  %v108_v8 = vadd.f32 1e-05, %v100_v6 }
 0x129   :  { %v85_v9 = vpop.xlane.xlu1 %84  ;;  %v94_v10 = vpop.xlane.xlu0 %93 }
 0x12a   :  { %433 = vrsqrt.f32 %v111_v7  ;;  %v101_v11 = vmul.f32 0.03125, %v85_v9  ;;  %v104_v12 = vmul.f32 0.03125, %v94_v10 }
 0x12b   :  { %435 = vrsqrt.f32 %v108_v8 }
 0x12c   :  { %v109_v13 = vadd.f32 1e-05, %v101_v11  ;;  %v112_v14 = vadd.f32 1e-05, %v104_v12 }
 0x12d   :  { %v97_v15 = vpop.xlane.xlu1 %96 }
 0x12e   :  { %437 = vrsqrt.f32 %v109_v13  ;;  %v105_v16 = vmul.f32 0.03125, %v97_v15 }
 0x12f   :  { %439 = vrsqrt.f32 %v112_v14  ;;  %v428_v18 = vpop.eup %427 }
 0x130   :  { %v113_v17 = vadd.f32 1e-05, %v105_v16  ;;  %v122_v22 = vmul.f32 %v428_v18, %v552_v20 }
 0x132   :  { %441 = vrsqrt.f32 %v113_v17 }
 0x133   :  { %v430_v19 = vpop.eup %429 }
 0x134   :  { %v123_v23 = vmul.f32 %v430_v19, %v560_v28  ;;  %v432_v24 = vpop.eup %431 }
 0x135   :  { %v126_v27 = vmul.f32 %v432_v24, %v554_v21 }
 0x136   :  { %v130_v25 = vpack.c.bf16 %v123_v23, %v122_v22 }
 0x137   :  { %v434_v26 = vpop.eup %433 }
 0x138   :  { %410 = vmatprep.mubr.msk.bf16.mxu0 %vm24_vm0, %v130_v25  ;;  %v127_v30 = vmul.f32 %v434_v26, %v562_v29  ;;  %v436_v31 = vpop.eup %435  ;;  %v346_v29 = vld [vmem:[%s618_s2] ss:$0 sm:$0xff]  ;;  %s497_s2 = smov [#allocation2]  }
 0x139   :  { %v124_v34 = vmul.f32 %v436_v31, %v570_v38  ;;  %s335_s5 = sshll.u32 %s497_s2, 4  ;;  %s336_s5 = int_to_ptr.vmem [resolvable:$true] %s335_s5 }
 0x13a   :  { %v132_v32 = vpack.c.bf16 %v127_v30, %v126_v27  ;;  %s475_s6 = scalar_lea.vmem %s336_s5, 512  ;;  %p480_p1 = scmp.lt.s32.totalorder %s336_s5, %s336_s5 }
 0x13b   :  { %v438_v33 = vpop.eup %437  ;;  %p476_p0 = scmp.ne.s32.totalorder %s336_s5, %s475_s6  ;;  %p481_p2 = scmp.lt.s32.totalorder %s475_s6, %s475_s6 }
 0x13c   :  { %414 = vmatprep.mubr.msk.bf16.mxu1 %vm24_vm0, %v132_v32  ;;  %v125_v20 = vmul.f32 %v438_v33, %v572_v39  ;;  %v440_v35 = vpop.eup %439 }
 0x13d   :  { %v128_v37 = vmul.f32 %v440_v35, %v580_v48  ;;  %p482_p3 = por %p481_p2, %p480_p1 }
 0x13e   :  { %v131_v28 = vpack.c.bf16 %v125_v20, %v124_v34 }
 0x13f   :  { %v442_v36 = vpop.eup %441  ;;  %p483_p4 = pnand %p482_p3, %p476_p0 }
 0x140   :  { %411 = vmatmul.mubr.msk.bf16.vlgmr.msra.gmra.mxu0 %vm24_vm0, %v131_v28  ;;  %v129_v21 = vmul.f32 %v442_v36, %v582_v49 }
 0x142   :  { %v133_v40 = vpack.c.bf16 %v129_v21, %v128_v37 }
 0x144   :  { %415 = vmatmul.mubr.msk.bf16.vlgmr.msra.gmra.mxu1 %vm24_vm0, %v133_v40 }
 0x200   :  { %v412_v41 = vpop.f32.mrf.mxu0 }
 0x201   :  { %v212_v38 = vadd.f32 %v412_v41, %v346_v29 }
 0x202   :  { %v203_v42 = vpop.f32.mrf.mxu0 }
 0x203   :  { %v355_v39 = vmul.f32 -1.442695, %v212_v38  ;;  %v204_v43 = vadd.f32 %v346_v29, %v203_v42 }
 0x204   :  { %v413_v44 = vpop.f32.mrf.mxu0  ;;  %v416_v45 = vpop.f32.mrf.mxu1 }
 0x205   :  { %443 = vpow2.f32 %v355_v39  ;;  %v353_v46 = vmul.f32 -1.442695, %v204_v43  ;;  %v215_v47 = vadd.f32 %v413_v44, %v346_v29  ;;  %v228_v48 = vadd.f32 %v416_v45, %v346_v29 }
 0x206   :  { %v206_v50 = vpop.f32.mrf.mxu0  ;;  %v219_v49 = vpop.f32.mrf.mxu1 }
 0x207   :  { %445 = vpow2.f32 %v353_v46  ;;  %v356_v51 = vmul.f32 -1.442695, %v215_v47  ;;  %v359_v52 = vmul.f32 -1.442695, %v228_v48  ;;  %v207_v53 = vadd.f32 %v346_v29, %v206_v50 }
 0x208   :  { %v220_v54 = vadd.f32 %v346_v29, %v219_v49  ;;  %v417_v55 = vpop.f32.mrf.mxu1 }
 0x209   :  { %447 = vpow2.f32 %v356_v51  ;;  %v354_v56 = vmul.f32 -1.442695, %v207_v53  ;;  %v231_v57 = vadd.f32 %v417_v55, %v346_v29 }
 0x20a   :  { %449 = vpow2.f32 %v359_v52  ;;  %v357_v58 = vmul.f32 -1.442695, %v220_v54  ;;  %v222_v59 = vpop.f32.mrf.mxu1 }
 0x20b   :  { %451 = vpow2.f32 %v354_v56  ;;  %v360_v60 = vmul.f32 -1.442695, %v231_v57  ;;  %v223_v61 = vadd.f32 %v346_v29, %v222_v59 }
 0x20c   :  { %453 = vpow2.f32 %v357_v58 }
 0x20d   :  { %455 = vpow2.f32 %v360_v60  ;;  %v358_v62 = vmul.f32 -1.442695, %v223_v61 }
 0x20f   :  { %457 = vpow2.f32 %v358_v62 }
 0x212   :  { %v444_v63 = vpop.eup %443 }
 0x213   :  { %v260_v0 = vadd.f32 1.0, %v444_v63 }
 0x214   :  { %v446_v1 = vpop.eup %445 }
 0x215   :  { %v258_v2 = vadd.f32 1.0, %v446_v1  ;;  %459 = vrcp.f32 %v260_v0 }
 0x216   :  { %v448_v3 = vpop.eup %447 }
 0x217   :  { %v450_v4 = vpop.eup %449  ;;  %v261_v5 = vadd.f32 1.0, %v448_v3  ;;  %461 = vrcp.f32 %v258_v2 }
 0x218   :  { %v452_v6 = vpop.eup %451  ;;  %v264_v7 = vadd.f32 1.0, %v450_v4 }
 0x219   :  { %v454_v8 = vpop.eup %453  ;;  %463 = vrcp.f32 %v261_v5  ;;  %v259_v9 = vadd.f32 1.0, %v452_v6 }
 0x21a   :  { %v456_v10 = vpop.eup %455  ;;  %465 = vrcp.f32 %v264_v7  ;;  %v262_v11 = vadd.f32 1.0, %v454_v8 }
 0x21b   :  { %467 = vrcp.f32 %v259_v9  ;;  %v265_v12 = vadd.f32 1.0, %v456_v10 }
 0x21c   :  { %v458_v13 = vpop.eup %457  ;;  %469 = vrcp.f32 %v262_v11 }
 0x21d   :  { %471 = vrcp.f32 %v265_v12  ;;  %v263_v14 = vadd.f32 1.0, %v458_v13 }
 0x21f   :  { %473 = vrcp.f32 %v263_v14 }
 0x222   :  { %v460_v15 = vpop.eup %459 }
 0x223   :  { %v284_v19 = vmul.f32 %v460_v15, %v212_v38 }
 0x224   :  { %v462_v16 = vpop.eup %461 }
 0x225   :  { %v282_v25 = vmul.f32 %v462_v16, %v204_v43 }
 0x226   :  { %v464_v17 = vpop.eup %463 }
 0x227   :  { %v466_v18 = vpop.eup %465  ;;  %v285_v22 = vmul.f32 %v464_v17, %v215_v47 }
 0x228   :  { %v468_v23 = vpop.eup %467  ;;  %v288_v31 = vmul.f32 %v466_v18, %v228_v48 }
 0x229   :  { %v470_v24 = vpop.eup %469  ;;  %v385_v26 = vpack.c.bf16 %v285_v22, %v284_v19  ;;  %v283_v27 = vmul.f32 %v468_v23, %v207_v53 }
 0x22a   :  { %v472_v30 = vpop.eup %471  ;;  %v286_v20 = vmul.f32 %v470_v24, %v220_v54 }
 0x22b   :  { %397 = vst [vmem:[#allocation2 + $0x8] sm:$0xff] %v385_v26   ;;  %v380_v32 = vpack.c.bf16 %v283_v27, %v282_v25  ;;  %v289_v33 = vmul.f32 %v472_v30, %v231_v57 }
 0x22c   :  { %v474_v34 = vpop.eup %473 }
 0x22d   :  { %381 = vst [vmem:[#allocation2] sm:$0xff] %v380_v32   ;;  %v395_v35 = vpack.c.bf16 %v289_v33, %v288_v31  ;;  %v287_v28 = vmul.f32 %v474_v34, %v223_v61 }
 0x22f   :  { %399 = vst [vmem:[#allocation2 + $0x18] sm:$0xff] %v395_v35   ;;  %v390_v36 = vpack.c.bf16 %v287_v28, %v286_v20 }
 0x231   :  { %398 = vst [vmem:[#allocation2 + $0x10] sm:$0xff] %v390_v36  }
 0x232   :  { %486 = shalt.err (!%p483_p4)
}
 0x233   :  { %s498_s7 = smov 64   ;;  %s499_s8 = smov 4  }
 0x234   :  { %341 = dma.vmem_to_hbm [thread:$0]  %s336_s5, 512, %s619_s3, [#allocation3], %s498_s7, %s498_s7, %s499_s8  }
 0x235   :  { %495 = dma.done.wait [#allocation3], 512  }
 0x236   :  { %496 = vsyncadd [#allocation3], 4294966784 }
 0x237   :  { %345 = vsyncpa [#allocation3], 1 }

</bundles_post_ra>
